<compile_context>
chip_gen: v6e
topology: v6e:2x2x1
jax: 0.10.0
libtpu: 0.0.40
codegen_flags: <defaults>
</compile_context>

<pallas_src>
import functools

import jax
import jax.numpy as jnp
from jax.experimental import pallas as pl
from jax.experimental.pallas import tpu as pltpu

_LANE = 128
_SQRT1_2 = 0.7071067811865476


def _round_up(x, m):
    return (x + m - 1) // m * m


def _gelu_exact(x):
    # PyTorch nn.GELU() default = exact erf formulation, evaluated in f32.
    # TODO(synk): if profiling shows the erf polynomial makes the VPU the
    # binding slot, switch to an EUP-routed (tanh/exp) form after verifying
    # accuracy against torch's exact GELU.
    return 0.5 * x * (1.0 + jax.lax.erf(x * _SQRT1_2))


def _tpu_vmem_capacity():
    try:
        return int(pltpu.get_tpu_info().vmem_capacity_bytes)
    except Exception:
        return 64 << 20            # conservative fallback (v7x per-core VMEM)


def _vmem_budget():
    # Use ~half of physical VMEM for our working set: 64 MiB on 128-MiB parts
    # (v5e/v6e), 32 MiB on 64-MiB-per-core parts (v7x).
    return min(_tpu_vmem_capacity() // 2, 64 << 20)


def _choose_hidden_chunk(c_in, c_hid, c_out, mm_bytes, budget=None):
    """Hidden-dim chunk tk.  Single chunk (weights resident) when they fit."""
    if budget is None:
        budget = _vmem_budget()
    full = 2 * c_hid * (c_in + c_out) * mm_bytes      # both weights, 2 buffers
    if full <= budget // 2 or c_hid <= _LANE:
        return c_hid
    c_hid_128 = _round_up(c_hid, _LANE)
    for cand in (512, 256, 128):                      # multiples of 128
        if c_hid_128 % cand == 0 and 2 * cand * (c_in + c_out) * mm_bytes <= budget // 2:
            return cand
    return _LANE


def _choose_spatial_tile(hw, c_in, c_out, tk, act_bytes, mm_bytes,
                         ts_max=512, budget=None):
    """Spatial (lane) tile ts and a VMEM working-set estimate."""
    if budget is None:
        budget = _vmem_budget()
    w_blk = 2 * tk * (c_in + c_out) * mm_bytes        # weight chunks, 2 buffers
    per_lane = (2 * c_in * act_bytes                  # X block (double-buffered)
                + 2 * c_out * act_bytes               # out block (double-buffered)
                + c_out * 4                           # f32 accumulator scratch
                + tk * (4 + mm_bytes)                 # h (f32) + its MXU cast
                + c_in * mm_bytes)                    # x MXU cast
    avail = max(budget - w_blk, 1 << 20)
    ts_cap = min(ts_max, max(_LANE, (avail // per_lane) // _LANE * _LANE))
    ts = hw if hw <= ts_cap else ts_cap               # lane-dense; ragged tail ok
    return ts, w_blk + per_lane * ts


def prepare_conv_ffn_weights(w1, w2, matmul_dtype=jnp.bfloat16):
    """Cast weights to the MXU dtype and pad the hidden dim to the chunk size.

    Hoist this to parameter-prep time in a real model; conv_ffn_pallas calls it
    per-forward only when raw weights are passed.
    """
    mm = jnp.dtype(matmul_dtype)
    c_hid, c_in = w1.shape
    c_out = w2.shape[0]
    tk = _choose_hidden_chunk(c_in, c_hid, c_out, mm.itemsize)
    c_hid_p = _round_up(c_hid, tk)
    # Zero padding of the hidden dim is exact: gelu(0) = 0 and the padded W2
    # columns are zero, so padded chunks contribute nothing.
    w1_p = jnp.pad(w1.astype(mm), ((0, c_hid_p - c_hid), (0, 0)))
    w2_p = jnp.pad(w2.astype(mm), ((0, 0), (0, c_hid_p - c_hid)))
    return w1_p, w2_p, tk


def conv_ffn_kernel(x_ref, w1_ref, w2_ref, o_ref, acc_ref, *, mm_dtype, precision):
    # x_ref:  (1, C_in, ts)   activation dtype, resident across the k axis
    # w1_ref: (tk, C_in)      MXU dtype, hidden chunk k
    # w2_ref: (C_out, tk)     MXU dtype, hidden chunk k
    # o_ref:  (1, C_out, ts)  written only on the last hidden chunk
    # acc_ref:(C_out, ts)     f32 VMEM accumulator
    k = pl.program_id(2)

    @pl.when(k == 0)
    def _init():
        acc_ref[...] = jnp.zeros_like(acc_ref)

    # First 1x1 conv on this hidden chunk: h = gelu(W1[k] @ X), f32 GELU.
    xm = x_ref[0].astype(mm_dtype)
    h = jnp.dot(w1_ref[...], xm,
                preferred_element_type=jnp.float32, precision=precision)
    h = _gelu_exact(h)

    # Second 1x1 conv, accumulated over hidden chunks into VMEM scratch.
    acc_ref[...] += jnp.dot(w2_ref[...], h.astype(mm_dtype),
                            preferred_element_type=jnp.float32, precision=precision)

    @pl.when(k == pl.num_programs(2) - 1)
    def _finalize():
        # Re-read x from VMEM for the residual (cheap vld; avoids keeping the
        # activation live in vregs across the whole reduction).
        y = _gelu_exact(acc_ref[...]) + x_ref[0].astype(jnp.float32)
        o_ref[0] = y.astype(o_ref.dtype)


def conv_ffn_pallas(x_nchw, w1, w2, *, matmul_dtype=jnp.bfloat16, precision=None,
                    prepared_weights=None, ts_max=512):
    """ConvFFN forward: gelu(pw2(gelu(pw1(x)))) + x, NCHW in / NCHW out.

    x_nchw: [B, C_in, H, W]
    w1: [C_hid, C_in]   (Conv2d weight [O, I, 1, 1] squeezed)
    w2: [C_out, C_hid]  (C_out == C_in)
    matmul_dtype: MXU operand dtype (default bf16); GELU, accumulation and the
      residual always stay in float32.
    precision: forwarded to jnp.dot; pass jax.lax.Precision.HIGHEST together
      with matmul_dtype=jnp.float32 for strict PyTorch-float32 matmul semantics.
    """
    B, C_in, H, W = x_nchw.shape
    C_hid, c_in_w = w1.shape
    C_out, c_hid_w = w2.shape
    assert c_in_w == C_in and c_hid_w == C_hid
    assert C_out == C_in, "residual requires out_channels == in_channels"

    if prepared_weights is None:
        # TODO(synk): hoist this to parameter-prep time in a real model; the
        # per-call pad+cast is redundant HBM traffic for small-batch inference.
        prepared_weights = prepare_conv_ffn_weights(w1, w2, matmul_dtype)
    w1_p, w2_p, tk = prepared_weights
    mm_dtype = jnp.dtype(w1_p.dtype)
    c_hid_p = w1_p.shape[0]
    n_k = c_hid_p // tk

    HW = H * W
    # Free reshape: merges the trailing contiguous dims, no HBM transpose.
    x3 = x_nchw.reshape(B, C_in, HW)

    act_bytes = jnp.dtype(x_nchw.dtype).itemsize
    ts, est = _choose_spatial_tile(HW, C_in, C_out, tk, act_bytes,
                                   mm_dtype.itemsize, ts_max=ts_max)
    n_s = pl.cdiv(HW, ts)

    vmem_cap = _tpu_vmem_capacity()
    vmem_limit = int(min(max(est + (8 << 20), 24 << 20), vmem_cap * 5 // 8))

    out = pl.pallas_call(
        functools.partial(conv_ffn_kernel, mm_dtype=mm_dtype, precision=precision),
        out_shape=jax.ShapeDtypeStruct((B, C_out, HW), x_nchw.dtype),
        grid_spec=pltpu.PrefetchScalarGridSpec(
            num_scalar_prefetch=0,
            grid=(B, n_s, n_k),                       # hidden (reduction) axis last
            in_specs=[
                # X block: resident across the k axis (index_map ignores k).
                pl.BlockSpec((1, C_in, ts), lambda b, s, k: (b, 0, s)),
                # Hidden chunks of the weights stream with k (pipelined DMAs).
                pl.BlockSpec((tk, C_in), lambda b, s, k: (k, 0)),
                pl.BlockSpec((C_out, tk), lambda b, s, k: (0, k)),
            ],
            out_specs=pl.BlockSpec((1, C_out, ts), lambda b, s, k: (b, 0, s)),
            scratch_shapes=[pltpu.VMEM((C_out, ts), jnp.float32)],
        ),
        compiler_params=pltpu.CompilerParams(
            dimension_semantics=("parallel", "parallel", "arbitrary"),
            vmem_limit_bytes=vmem_limit),
    )(x3, w1_p, w2_p)

    return out.reshape(B, C_out, H, W)


def conv_ffn_reference(x_nchw, w1, w2):
    # Pure-JAX reference mirroring the PyTorch forward (1x1 convs as matmuls),
    # with HIGHEST precision so it reflects true float32 semantics.
    hp = jax.lax.Precision.HIGHEST
    h = _gelu_exact(jnp.einsum("oc,bchw->bohw", w1, x_nchw, precision=hp))
    y = _gelu_exact(jnp.einsum("oc,bchw->bohw", w2, h, precision=hp))
    return y + x_nchw


if __name__ == "__main__":
    B, C, Hsp, Wsp = 2, 4, 16, 16
    expend_ratio = 4
    C_hid = C * expend_ratio

    key = jax.random.PRNGKey(0)
    kx, kw1, kw2 = jax.random.split(key, 3)

    x = jax.random.normal(kx, (B, C, Hsp, Wsp), dtype=jnp.float32)
    # Synthetic weights with Conv2d(..., kernel_size=1, bias=False) shapes
    # ([O, I, 1, 1] squeezed to [O, I]).
    w1 = jax.random.normal(kw1, (C_hid, C), dtype=jnp.float32) * (1.0 / jnp.sqrt(C))
    w2 = jax.random.normal(kw2, (C, C_hid), dtype=jnp.float32) * (1.0 / jnp.sqrt(C_hid))

    ref = conv_ffn_reference(x, w1, w2)

    # Default (production) path: bf16 MXU operands, f32 GELU/accum/residual.
    out = jax.block_until_ready(conv_ffn_pallas(x, w1, w2))
    assert out.shape == (B, C, Hsp, Wsp)
    assert jnp.allclose(out, ref, atol=1e-1, rtol=1e-1), "bf16-MXU path mismatch"

    # f32-operand path (default MXU precision; pass
    # precision=jax.lax.Precision.HIGHEST for strict PyTorch-f32 matching).
    out_f32 = jax.block_until_ready(
        conv_ffn_pallas(x, w1, w2, matmul_dtype=jnp.float32))
    assert jnp.allclose(out_f32, ref, atol=5e-2, rtol=5e-2), "f32 path mismatch"

    print("KERNEL_OK")
</pallas_src>

<mosaic_0001>
module attributes {stable_mosaic.version = 11 : i64} {
  func.func @conv_ffn_kernel(%arg0: i32, %arg1: i32, %arg2: i32, %arg3: memref<1x4x256xf32, #tpu.memory_space<vmem>>, %arg4: memref<16x4xbf16, #tpu.memory_space<vmem>>, %arg5: memref<4x16xbf16, #tpu.memory_space<vmem>>, %arg6: memref<1x4x256xf32, #tpu.memory_space<vmem>>, %arg7: memref<4x256xf32, #tpu.memory_space<vmem>>) attributes {dimension_semantics = [#tpu.dimension_semantics<parallel>, #tpu.dimension_semantics<parallel>, #tpu.dimension_semantics<arbitrary>], iteration_bounds = array<i64: 2, 1, 1>, scalar_prefetch = 0 : i64, scratch_operands = 1 : i64, tpu.core_type = #tpu.core_type<tc>, window_params = [{transform_indices = @transform_0, window_bounds = array<i64: 1, 4, 256>}, {transform_indices = @transform_1, window_bounds = array<i64: 16, 4>}, {transform_indices = @transform_2, window_bounds = array<i64: 4, 16>}, {transform_indices = @transform_3, window_bounds = array<i64: 1, 4, 256>}]} {
    %c0_i32 = arith.constant 0 : i32
    %0 = arith.cmpi eq, %arg2, %c0_i32 : i32
    %1 = arith.extui %0 : i1 to i32
    %c0_i32_0 = arith.constant 0 : i32
    %2 = arith.cmpi ne, %1, %c0_i32_0 : i32
    scf.if %2 {
      %cst_17 = arith.constant 0.000000e+00 : f32
      %25 = vector.broadcast %cst_17 : f32 to vector<4x256xf32>
      %c0_18 = arith.constant 0 : index
      %c0_19 = arith.constant 0 : index
      %26 = vector.load %arg7[%c0_18, %c0_19] : memref<4x256xf32, #tpu.memory_space<vmem>>, vector<4x256xf32>
      tpu.vector_store %arg7[%c0_18, %c0_19], %25 {strides = array<i32>} : memref<4x256xf32, #tpu.memory_space<vmem>>, vector<4x256xf32>,
    } else {
    }
    %c0 = arith.constant 0 : index
    %c0_1 = arith.constant 0 : index
    %c0_2 = arith.constant 0 : index
    %3 = vector.load %arg3[%c0, %c0_1, %c0_2] : memref<1x4x256xf32, #tpu.memory_space<vmem>>, vector<1x4x256xf32>
    %4 = vector.shape_cast %3 : vector<1x4x256xf32> to vector<4x256xf32>
    %5 = arith.truncf %4 : vector<4x256xf32> to vector<4x256xbf16>
    %c0_3 = arith.constant 0 : index
    %c0_4 = arith.constant 0 : index
    %6 = vector.load %arg4[%c0_3, %c0_4] : memref<16x4xbf16, #tpu.memory_space<vmem>>, vector<16x4xbf16>
    %cst = arith.constant dense<0.000000e+00> : vector<16x256xf32>
    %7 = tpu.matmul %6, %5, %cst {dimension_numbers = #tpu.dot_dimension_numbers<[1], [0], [0], [1], [0, 0, 1, 1], [], []>} : vector<16x4xbf16>, vector<4x256xbf16>, vector<16x256xf32> -> vector<16x256xf32>
    %cst_5 = arith.constant 5.000000e-01 : f32
    %8 = vector.broadcast %cst_5 : f32 to vector<16x256xf32>
    %9 = arith.mulf %8, %7 : vector<16x256xf32>
    %cst_6 = arith.constant 0.707106769 : f32
    %10 = vector.broadcast %cst_6 : f32 to vector<16x256xf32>
    %11 = arith.mulf %7, %10 : vector<16x256xf32>
    %12 = math.erf %11 : vector<16x256xf32>
    %cst_7 = arith.constant 1.000000e+00 : f32
    %13 = vector.broadcast %cst_7 : f32 to vector<16x256xf32>
    %14 = arith.addf %13, %12 : vector<16x256xf32>
    %15 = arith.mulf %9, %14 : vector<16x256xf32>
    %c0_8 = arith.constant 0 : index
    %c0_9 = arith.constant 0 : index
    %16 = vector.load %arg7[%c0_8, %c0_9] : memref<4x256xf32, #tpu.memory_space<vmem>>, vector<4x256xf32>
    %c0_10 = arith.constant 0 : index
    %c0_11 = arith.constant 0 : index
    %17 = vector.load %arg5[%c0_10, %c0_11] : memref<4x16xbf16, #tpu.memory_space<vmem>>, vector<4x16xbf16>
    %18 = arith.truncf %15 : vector<16x256xf32> to vector<16x256xbf16>
    %cst_12 = arith.constant dense<0.000000e+00> : vector<4x256xf32>
    %19 = tpu.matmul %17, %18, %cst_12 {dimension_numbers = #tpu.dot_dimension_numbers<[1], [0], [0], [1], [0, 0, 1, 1], [], []>} : vector<4x16xbf16>, vector<16x256xbf16>, vector<4x256xf32> -> vector<4x256xf32>
    %20 = arith.addf %16, %19 : vector<4x256xf32>
    %c0_13 = arith.constant 0 : index
    %c0_14 = arith.constant 0 : index
    %21 = vector.load %arg7[%c0_13, %c0_14] : memref<4x256xf32, #tpu.memory_space<vmem>>, vector<4x256xf32>
    tpu.vector_store %arg7[%c0_13, %c0_14], %20 {strides = array<i32>} : memref<4x256xf32, #tpu.memory_space<vmem>>, vector<4x256xf32>,
    %c0_i32_15 = arith.constant 0 : i32
    %22 = arith.cmpi eq, %arg2, %c0_i32_15 : i32
    %23 = arith.extui %22 : i1 to i32
    %c0_i32_16 = arith.constant 0 : i32
    %24 = arith.cmpi ne, %23, %c0_i32_16 : i32
    scf.if %24 {
      %c0_17 = arith.constant 0 : index
      %c0_18 = arith.constant 0 : index
      %25 = vector.load %arg7[%c0_17, %c0_18] : memref<4x256xf32, #tpu.memory_space<vmem>>, vector<4x256xf32>
      %cst_19 = arith.constant 5.000000e-01 : f32
      %26 = vector.broadcast %cst_19 : f32 to vector<4x256xf32>
      %27 = arith.mulf %26, %25 : vector<4x256xf32>
      %cst_20 = arith.constant 0.707106769 : f32
      %28 = vector.broadcast %cst_20 : f32 to vector<4x256xf32>
      %29 = arith.mulf %25, %28 : vector<4x256xf32>
      %30 = math.erf %29 : vector<4x256xf32>
      %cst_21 = arith.constant 1.000000e+00 : f32
      %31 = vector.broadcast %cst_21 : f32 to vector<4x256xf32>
      %32 = arith.addf %31, %30 : vector<4x256xf32>
      %33 = arith.mulf %27, %32 : vector<4x256xf32>
      %c0_22 = arith.constant 0 : index
      %c0_23 = arith.constant 0 : index
      %c0_24 = arith.constant 0 : index
      %34 = vector.load %arg3[%c0_22, %c0_23, %c0_24] : memref<1x4x256xf32, #tpu.memory_space<vmem>>, vector<1x4x256xf32>
      %35 = vector.shape_cast %34 : vector<1x4x256xf32> to vector<4x256xf32>
      %36 = arith.addf %33, %35 : vector<4x256xf32>
      %c0_25 = arith.constant 0 : index
      %c0_26 = arith.constant 0 : index
      %c0_27 = arith.constant 0 : index
      %37 = vector.load %arg6[%c0_25, %c0_26, %c0_27] : memref<1x4x256xf32, #tpu.memory_space<vmem>>, vector<1x4x256xf32>
      %38 = vector.shape_cast %37 : vector<1x4x256xf32> to vector<4x256xf32>
      %39 = vector.shape_cast %36 : vector<4x256xf32> to vector<1x4x256xf32>
      tpu.vector_store %arg6[%c0_25, %c0_26, %c0_27], %39 {strides = array<i32>} : memref<1x4x256xf32, #tpu.memory_space<vmem>>, vector<1x4x256xf32>,
    } else {
    }
    return
  }
  func.func @transform_0(%arg0: i32, %arg1: i32, %arg2: i32) -> (i32, i32, i32) {
    %c0_i32 = arith.constant 0 : i32
    %c0_i32_0 = arith.constant 0 : i32
    return %arg0, %c0_i32, %arg1 : i32, i32, i32
  }
  func.func @transform_1(%arg0: i32, %arg1: i32, %arg2: i32) -> (i32, i32) {
    %c0_i32 = arith.constant 0 : i32
    %c0_i32_0 = arith.constant 0 : i32
    return %arg2, %c0_i32 : i32, i32
  }
  func.func @transform_2(%arg0: i32, %arg1: i32, %arg2: i32) -> (i32, i32) {
    %c0_i32 = arith.constant 0 : i32
    %c0_i32_0 = arith.constant 0 : i32
    return %c0_i32, %arg2 : i32, i32
  }
  func.func @transform_3(%arg0: i32, %arg1: i32, %arg2: i32) -> (i32, i32, i32) {
    %c0_i32 = arith.constant 0 : i32
    %c0_i32_0 = arith.constant 0 : i32
    return %arg0, %c0_i32, %arg1 : i32, i32, i32
  }
}

</mosaic_0001>

<bundles_post_ra>
// kernel: tpu_custom_call.1
= control target key start
LH: loop header
LB: loop body
LE: loop exit
PB: predicated region body
PF: predicated region fallthrough
CT: control target
= control target key end

     0   :  { %8 = vsyncpa [#allocation4], 0  ;;  %s922_s0 = inlined_call_operand.hbm [shape: f32[2,4,256], index: 0, kind: input, shape index: {}]   ;;  %s923_s1 = inlined_call_operand.vmem [shape: bf16[16,4], index: 1, kind: input, shape index: {}]   ;;  %s924_s2 = inlined_call_operand.vmem [shape: bf16[4,16], index: 2, kind: input, shape index: {}]   ;;  %s925_s3 = inlined_call_operand.hbm [shape: f32[2,4,256], index: 3, kind: output, shape index: {}]  }
   0x1   :  { %10 = vsyncpa [#allocation4 + $0x1], 0 }
   0x2   :  { %11 = vsyncpa [#allocation5], 0 }
   0x3   :  { %13 = vsyncpa [#allocation5 + $0x1], 0  ;;  %s778_s12 = smov 0   ;;  %s780_s13 = smov 0  }
   0x4   :  { %s782_s14 = smov 0   ;;  %s784_s15 = smov 0  }
   0x5   :  { %s786_s16 = smov 0   ;;  %s788_s17 = smov 0  }
   0x6 LB: > { %s547_s18 = sadd.s32 4294967295, %s753_s17   ;;  %s548_s19 = sadd.s32 4294967294, %s753_s17   ;;  %s753_s17 = sphi %s788_s17, %s19_s17   ;;  %s749_s16 = sphi %s786_s16, %s937_s16   ;;  %s745_s15 = sphi %s784_s15, %s936_s15   ;;  %s741_s14 = sphi %s782_s14, %s935_s14   ;;  %s737_s13 = sphi %s780_s13, %s934_s13   ;;  %s733_s12 = sphi %s778_s12, %s933_s12  }
   0x7   : > { %s38_s20 = sadd.s32 1, %s749_s16  ;;  %s47_s21 = sadd.s32 1, %s741_s14 }
   0x8   : > { %p40_p0 = scmp.ge.s32.totalorder %s38_s20, 2  ;;  %p54_p1 = scmp.ne.s32.totalorder %s741_s14, %s737_s13 }
   0x9   : > { %p55_p2 = scmp.eq.s32.totalorder %s753_s17, 0  ;;  %p60_p3 = scmp.ne.s32.totalorder %s737_s13, %s733_s12 }
   0xa   : > { %s939_s20 = smov (%p40_p0, %s38_s20), 0  ;;  %p61_p5 = scmp.eq.s32.totalorder %s547_s18, 0 }
   0xb   : > { %p819_p4 = por %p55_p2, %p54_p1  ;;  %s42_s23 = ssub.s32 %s749_s16, %s939_s20 }
   0xc   : > { %p138_p6 = scmp.eq.s32.totalorder %s547_s18, 1  ;;  %p45_p7 = scmp.eq.s32.totalorder %s42_s23, 0 }
   0xd   : > { %p825_p8 = por %p61_p5, %p60_p3  ;;  %p144_p10 = scmp.eq.s32.totalorder %s548_s19, 1 }
   0xe   : > { %p829_p9 = por %p138_p6, %p54_p1  ;;  %p582_p13 = scmp.lt.s32.totalorder %s753_s17, 2 }
   0xf   : > { %s834_s26 = scalar_select %p45_p7, %s741_s14, %s47_s21  }
  0x10   : > { %p836_p11 = por %p144_p10, %p60_p3  ;;  %s180_s28 = sand.u32 1, %s741_s14  }
  0x11   : > { %s553_s29 = sshll.u32 %s180_s28, 3  ;;  %s568_s30 = sshll.u32 %s749_s16, 7 }
  0x12   : > { %s929_s27 = scalar_select %p836_p11, 1, 0 }
  0x13   : > { %s192_s6 = scalar_lea.hbm %s922_s0, %s568_s30  ;;  %s184_s7 = scalar_lea.vmem [#allocation3], %s553_s29 }
  0x14   : > { %s194_s8 = sshll.u32 %s184_s7, 4  ;;  %p849_p0 = pnand %p582_p13, %p819_p4  ;;  %s195_s8 = int_to_ptr.vmem [resolvable:$true] %s194_s8 }
  0x15   : > { %p556_p1 = scmp.ge.s32.totalorder %s753_s17, 1  ;;  %p199_p2 = scmp.lt.s32.totalorder %s753_s17, 3 }
  0x16   : > { %s181_s10 = scalar_lea.sflag [#allocation4], %s180_s28  ;;  %p647_p3 = pneg %p849_p0 }
  0x17   : > { %s658_s11 = scalar_lea.vmem %s195_s8, 128  ;;  %s755_s18 = smov [#allocation3]  }
  0x18   : > { %p659_p5 = scmp.ne.s32.totalorder %s195_s8, %s658_s11  ;;  %s663_s19 = sshll.u32 %s755_s18, 4  ;;  %s664_s19 = int_to_ptr.vmem [resolvable:$false] %s663_s19 }
  0x19   : > { %s665_s21 = scalar_lea.vmem %s664_s19, 256  ;;  %p666_p10 = scmp.lt.s32.totalorder %s195_s8, %s664_s19 }
  0x1a   : > { %p661_p6 = pnand %p659_p5, %p647_p3  ;;  %p667_p12 = scmp.lt.s32.totalorder %s665_s21, %s658_s11 }
  0x1c   : > { %p662_p7 = pneg %p661_p6  ;;  %p668_p4 = por %p667_p12, %p666_p10 }
  0x1e   : > { %p669_p13 = pnand %p668_p4, %p662_p7 }
  0x20   : > { %672 = shalt.err (!%p669_p13)
}
  0x21   : > { %577 = dma.hbm_to_vmem [thread:$0]  (!%p849_p0), %s192_s6, 128, %s195_s8, %s181_s10  }
  0x22   : > { %p200_p11 = pnand %p556_p1, %p199_p2 }
  0x23   : > { %s864_s22 = sand.u32 (!%p200_p11), 1, %s737_s13  }
  0x24   : > { %203 = sbr.rel (%p200_p11) target bundleno = 508 (0x1fc), region = 32  ;;  %s557_s23 = sshll.u32 (!%p200_p11), %s864_s22, 3 }
  0x25   : > { %s206_s28 = scalar_lea.sflag (!%p200_p11), [#allocation4], %s864_s22  ;;  %s209_s29 = scalar_lea.vmem (!%p200_p11), [#allocation3], %s557_s23 }
  0x29   : > { %724 = dma.done.wait (%p825_p8), %s206_s28, 128  }
  0x2a   : > { %726 = vsyncadd (%p825_p8), %s206_s28, 4294967168  ;;  %v756_v0 = vmov 0   ;;  %v259_v1 = vld [vmem:[%s209_s29] sm:$0xff]  ;;  %vm276_vm0 = vcmask 1041408   ;;  %vm272_vm1 = vcmask 31744   ;;  %vm350_vm2 = vcmask 130048  }
  0x2b   : > { %315 = vmatprep.mubr.bf16.mxu0 %v756_v0  ;;  %386 = vmatprep.mubr.bf16.mxu1 %v756_v0  ;;  %v261_v2 = vcombine.high %v259_v1, %v259_v1  ;;  %v263_v3 = vpack.c.bf16 %v259_v1, %v259_v1  ;;  %v634_v6 = vld [vmem:[%s923_s1] sm:$0xff]   ;;  %s569_s6 = sshll.u32 %s745_s15, 7  ;;  %s240_s7 = scalar_lea.vmem [#allocation6], %s557_s23 }
  0x2c   : > { %v347_v33 = vld [vmem:[%s924_s2] sm:$0x3]  ;;  %s430_s8 = sshll.u32 %s240_s7, 4  ;;  %s428_s11 = scalar_lea.hbm %s925_s3, %s569_s6  ;;  %s431_s8 = int_to_ptr.vmem [resolvable:$true] %s430_s8 }
  0x2d   : > { %v264_v4 = vpack.c.bf16 %v261_v2, %v261_v2  ;;  %v278_v5 = vsel %vm276_vm0, %v263_v3, 0  ;;  %s414_s18 = scalar_lea.sflag [#allocation5], %s864_s22  ;;  %s673_s19 = scalar_lea.vmem %s431_s8, 128 }
  0x2e   : > { %p674_p8 = scmp.ne.s32.totalorder %s431_s8, %s673_s19  ;;  %s757_s21 = smov [#allocation6]  }
  0x2f   : > { %560 = vmatprep.subr.msk.bf16.mxu0 %vm276_vm0, %v264_v4  ;;  %s677_s28 = sshll.u32 %s757_s21, 4  ;;  %s678_s28 = int_to_ptr.vmem [resolvable:$false] %s677_s28 }
  0x30   : > { %298 = vmatpush1.bf16.msra.mxu0 %v278_v5  ;;  %p675_p11 = pnand %p674_p8, %p829_p9  ;;  %s679_s15 = scalar_lea.vmem %s678_s28, 256 }
  0x31   : > { %p680_p0 = scmp.lt.s32.totalorder %s431_s8, %s678_s28  ;;  %p681_p1 = scmp.lt.s32.totalorder %s679_s15, %s673_s19 }
  0x32   : > { %p676_p12 = pneg %p675_p11 }
  0x33   : > { %561 = vmatmul.mubr.msk.bf16.vlgmr.msra.gmra.mxu0 %vm272_vm1, %v634_v6  ;;  %p682_p2 = por %p681_p1, %p680_p0 }
  0x35   : > { %p683_p3 = pnand %p682_p2, %p676_p12 }
  0xf3   : > { %v317_v7 = vpop.f32.mrf.mxu0 }
  0xf4   : > { %v330_v8 = vmul.f32 0.70710677, %v317_v7  ;;  %v326_v26 = vmul.f32 0.5, %v317_v7 }
  0xf5   : > { %v319_v9 = vpop.f32.mrf.mxu0 }
  0xf6   : > { %v331_v10 = vmul.f32 0.70710677, %v319_v9  ;;  %v327_v23 = vmul.f32 0.5, %v319_v9 }
  0xf7   : > { %v321_v11 = vpop.f32.mrf.mxu0 }
  0xf8   : > { %635 = verf.f32 %v331_v10  ;;  %v332_v12 = vmul.f32 0.70710677, %v321_v11  ;;  %v328_v21 = vmul.f32 0.5, %v321_v11 }
  0xf9   : > { %637 = verf.f32 %v330_v8  ;;  %v323_v13 = vpop.f32.mrf.mxu0 }
  0xfa   : > { %639 = verf.f32 %v332_v12  ;;  %v333_v14 = vmul.f32 0.70710677, %v323_v13  ;;  %v329_v24 = vmul.f32 0.5, %v323_v13 }
  0xfc   : > { %641 = verf.f32 %v333_v14 }
 0x105   : > { %v636_v15 = vpop.eup %635 }
 0x106   : > { %v638_v16 = vpop.eup %637  ;;  %v339_v18 = vadd.f32 1.0, %v636_v15 }
 0x107   : > { %v640_v17 = vpop.eup %639  ;;  %v338_v22 = vadd.f32 1.0, %v638_v16 }
 0x108   : > { %v340_v19 = vadd.f32 1.0, %v640_v17  ;;  %v343_v28 = vmul.f32 %v339_v18, %v327_v23 }
 0x109   : > { %v642_v20 = vpop.eup %641  ;;  %v342_v30 = vmul.f32 %v338_v22, %v326_v26 }
 0x10a   : > { %v341_v25 = vadd.f32 1.0, %v642_v20  ;;  %v344_v27 = vmul.f32 %v340_v19, %v328_v21 }
 0x10c   : > { %v345_v29 = vmul.f32 %v341_v25, %v329_v24  ;;  %v348_v32 = vpack.c.bf16 %v344_v27, %v342_v30 }
 0x10e   : > { %v349_v31 = vpack.c.bf16 %v345_v29, %v343_v28 }
 0x110   : > { %368 = vmatprep.subr.bf16.mxu1 %v349_v31 }
 0x111   : > { %369 = vmatpush1.bf16.msra.mxu1 %v348_v32 }
 0x114   : > { %562 = vmatmul.mubr.msk.bf16.vlgmr.msra.gmra.mxu1 %vm350_vm2, %v347_v33 }
 0x1d4   : > { %v388_v34 = vpop.f32.mrf.mxu1 }
 0x1d6   : > { %v390_v35 = vpop.f32.mrf.mxu1 }
 0x1d7   : > { %v397_v36 = vcombine.low %v388_v34, %v390_v35 }
 0x1d8   : > { %v392_v37 = vpop.f32.mrf.mxu1 }
 0x1d9   : > { %v406_v38 = vmul.f32 0.70710677, %v397_v36  ;;  %v405_v41 = vmul.f32 0.5, %v397_v36 }
 0x1da   : > { %v393_v39 = vpop.f32.mrf.mxu1 }
 0x1db   : > { %643 = verf.f32 %v406_v38 }
 0x1e8   : > { %v644_v40 = vpop.eup %643 }
 0x1e9   : > { %v408_v42 = vadd.f32 1.0, %v644_v40 }
 0x1eb   : > { %v409_v43 = vmul.f32 %v408_v42, %v405_v41 }
 0x1ed   : > { %v411_v44 = vadd.f32 %v409_v43, %v259_v1 }
 0x1ef   : > { %412 = vst [vmem:[%s240_s7] sm:$0xff] %v411_v44 }
 0x1f0   : > { %686 = shalt.err (!%p683_p3)
}
 0x1f1   : > { %s687_s23 = scalar_lea.hbm %s428_s11, 128  ;;  %s691_s30 = scalar_lea.hbm %s925_s3, 256 }
 0x1f2   : > { %p688_p5 = scmp.ne.s32.totalorder %s428_s11, %s687_s23  ;;  %p692_p10 = scmp.lt.s32.totalorder %s428_s11, %s925_s3 }
 0x1f3   : > { %p693_p4 = scmp.lt.s32.totalorder %s691_s30, %s687_s23 }
 0x1f4   : > { %p689_p6 = pnand %p688_p5, %p829_p9 }
 0x1f5   : > { %p694_p13 = por %p693_p4, %p692_p10 }
 0x1f6   : > { %p690_p7 = pneg %p689_p6 }
 0x1f8   : > { %p695_p8 = pnand %p694_p13, %p690_p7 }
 0x1fa   : > { %698 = shalt.err (!%p695_p8)
}
 0x1fb   : > { %572 = dma.vmem_to_hbm [thread:$0]  (%p829_p9), %s431_s8, 128, %s428_s11, %s414_s18  }
 0x1fc PF: > { %s442_s5 = sand.u32 1, %s733_s12   ;;  %p931_p11 = scmp.ne.s32.totalorder %s929_s27, 0 }
 0x1fd   : > { %p932_p12 = scmp.ge.s32.totalorder %s753_s17, 2  ;;  %s443_s6 = scalar_lea.sflag [#allocation5], %s442_s5 }
 0x1ff   : > { %p579_p0 = pnand %p932_p12, %p931_p11 }
 0x201   : > { %p580_p1 = pneg %p579_p0 }
 0x203   : > { %728 = dma.done.wait (%p580_p1), %s443_s6, 128  }
 0x204   : > { %730 = vsyncadd (%p580_p1), %s443_s6, 4294967168  ;;  %s19_s17 = sadd.s32 1, %s753_s17   ;;  %s933_s12 = smov %s737_s13 }
 0x205   : > { %p16_p2 = scmp.ge.s32.totalorder %s19_s17, 4   ;;  %s934_s13 = smov %s741_s14 }
 0x206   : > { %s935_s14 = smov %s834_s26  ;;  %s936_s15 = smov %s749_s16 }
 0x207   : > { %s937_s16 = smov %s939_s20  ;;  %18 = sbr.rel (!%p16_p2) target bundleno = 6 (0x6), region = 91 }
 0x20c   :  { %448 = vsyncpa [#allocation4], 1 }
 0x20d   :  { %450 = vsyncpa [#allocation4 + $0x1], 1 }
 0x20e   :  { %451 = vsyncpa [#allocation5], 1 }
 0x20f   :  { %453 = vsyncpa [#allocation5 + $0x1], 1 }

</bundles_post_ra>
